<compile_context>
chip_gen: v5e
topology: v5e:2x2
jax: 0.10.0
libtpu: 0.0.40
codegen_flags: <defaults>
</compile_context>

<pallas_src>
import functools

import jax
import jax.numpy as jnp
from jax import lax
from jax.experimental import pallas as pl
from jax.experimental.pallas import tpu as pltpu


def _conv3x3_kernel(x_ref, w_ref, b_ref, o_ref, *, W, TH, single_row_block):
    # x_ref: (1, Cin, Lp_pad)  flattened H-padded planes (resident per batch element)
    # w_ref: (TCout, 9*Cin)    weights, contraction index = (kh*3 + kw)*Cin + cin
    # b_ref: (TCout, 1)        f32 bias
    # o_ref: (1, TCout, TH*W)  one lane-dense output tile
    THW = TH * W

    if single_row_block:
        xwin = x_ref[0]                                        # (Cin, Lp_pad)
    else:
        # Row-block window [rb*TH, rb*TH + TH + 2) in flattened pixel coordinates;
        # start is a multiple of TH*W (itself a multiple of 128) -> aligned slice.
        r0 = pl.multiple_of(pl.program_id(2) * THW, THW)
        xwin = x_ref[0, :, pl.ds(r0, (TH + 2) * W)]            # (Cin, (TH+2)*W)
    Lw = xwin.shape[1]

    # Column index (mod W) of every flattened pixel -> padding masks for the kw taps.
    col = lax.broadcasted_iota(jnp.int32, (1, Lw), 1) % W
    zero = jnp.zeros((), dtype=xwin.dtype)
    x_c = xwin                                                                   # x[.., j  ]
    x_l = jnp.where(col == 0, zero, pltpu.roll(xwin, shift=1, axis=1))           # x[.., j-1]
    x_r = jnp.where(col == W - 1, zero, pltpu.roll(xwin, shift=Lw - 1, axis=1))  # x[.., j+1]

    # Transposed im2col patch: (9*Cin, TH*W).  Row block (kh*3 + kw) holds the tap
    # x[r + kh - 1, j + kw - 1, :] for every output pixel (r, j) of this row tile.
    taps = []
    for kh in range(3):
        for xs in (x_l, x_c, x_r):                             # kw = 0, 1, 2
            taps.append(xs[:, kh * W:kh * W + THW])
    patch_t = jnp.concatenate(taps, axis=0)                    # (9*Cin, TH*W)

    # Single MXU matmul with K = 9*Cin, f32 accumulation in vregs; f32 bias add;
    # lane-dense store (last dim TH*W).
    acc = jnp.dot(w_ref[...], patch_t, preferred_element_type=jnp.float32)
    o_ref[0] = (acc + b_ref[...]).astype(o_ref.dtype)


def _pick_row_tile(H, W, target_pixels=2048):
    """Rows per output tile: whole image if small; else the largest divisor of H whose
    tile is <= target_pixels output pixels and 128-lane aligned (for clean stores and
    aligned dynamic windowing of the resident image)."""
    if H * W <= target_pixels:
        return H
    best = H  # fallback: whole image per tile (see TODO at top for huge images)
    for d in range(1, H):
        if H % d == 0 and (d * W) % 128 == 0 and d * W <= target_pixels:
            best = d
    return best


def conv3x3_pallas(x_nchw, weight, bias):
    """x_nchw: (N, Cin, H, W); weight: (Cout, Cin, 3, 3); bias: (Cout,) -> NCHW output."""
    N, Cin, H, W = x_nchw.shape
    Cout = weight.shape[0]
    dtype = x_nchw.dtype

    TH = _pick_row_tile(H, W)
    n_rb = H // TH
    THW = TH * W

    # Cout tiling: a single unpadded tile when small; 256-wide tiles (minimal pad) otherwise.
    if Cout <= 256:
        TCout, Cout_p = Cout, Cout
    else:
        TCout = 256
        Cout_p = pl.cdiv(Cout, TCout) * TCout
    n_cb = Cout_p // TCout

    # Input: pad H by one halo row on each side (W edges are masked in-kernel), flatten
    # pixels, and pad the flattened axis to a lane-tile multiple so in-kernel rolls and
    # slices operate on clean tile-multiple widths.
    Lp = (H + 2) * W
    Lp_pad = pl.cdiv(Lp, 128) * 128
    x_flat = jnp.pad(x_nchw, ((0, 0), (0, 0), (1, 1), (0, 0))).reshape(N, Cin, Lp)
    if Lp_pad != Lp:
        x_flat = jnp.pad(x_flat, ((0, 0), (0, 0), (0, Lp_pad - Lp)))

    # Weights: OIHW -> (Cout, kh, kw, cin) -> (Cout, 9*Cin), cast to the activation dtype
    # (avoids silent f32 promotion when activations are bf16).  Bias stays f32.
    w_t = jnp.transpose(weight, (0, 2, 3, 1)).reshape(Cout, 9 * Cin).astype(dtype)
    b_t = bias.astype(jnp.float32).reshape(Cout, 1)
    if Cout_p != Cout:
        w_t = jnp.pad(w_t, ((0, Cout_p - Cout), (0, 0)))
        b_t = jnp.pad(b_t, ((0, Cout_p - Cout), (0, 0)))

    kernel = functools.partial(_conv3x3_kernel, W=W, TH=TH,
                               single_row_block=(n_rb == 1))

    out = pl.pallas_call(
        kernel,
        out_shape=jax.ShapeDtypeStruct((N, Cout_p, H * W), dtype),
        grid_spec=pltpu.PrefetchScalarGridSpec(
            num_scalar_prefetch=0,
            grid=(N, n_cb, n_rb),
            in_specs=[
                # Whole flattened image per batch element; index map ignores (cb, rb)
                # so the block stays resident in VMEM across those grid axes.
                pl.BlockSpec((1, Cin, Lp_pad), lambda n, cb, rb: (n, 0, 0)),
                pl.BlockSpec((TCout, 9 * Cin), lambda n, cb, rb: (cb, 0)),
                pl.BlockSpec((TCout, 1), lambda n, cb, rb: (cb, 0)),
            ],
            out_specs=pl.BlockSpec((1, TCout, THW), lambda n, cb, rb: (n, cb, rb)),
        ),
        compiler_params=pltpu.CompilerParams(
            # rb is "arbitrary" so megacore splits on N / Cout tiles and each core
            # fetches the resident image only once per batch element.
            dimension_semantics=("parallel", "parallel", "arbitrary"),
            vmem_limit_bytes=48 * 1024 * 1024,
        ),
    )(x_flat, w_t, b_t)

    if Cout_p != Cout:
        out = out[:, :Cout, :]
    return out.reshape(N, Cout, H, W)


if __name__ == "__main__":
    key = jax.random.PRNGKey(0)
    k_x, k_w, k_b = jax.random.split(key, 3)

    N, Cin, Cout, H, W = 2, 4, 8, 16, 16
    x = jax.random.normal(k_x, (N, Cin, H, W), dtype=jnp.float32)
    # Deterministic synthetic parameters matching Conv2d(Cin, Cout, 3) shapes.
    weight = jax.random.normal(k_w, (Cout, Cin, 3, 3), dtype=jnp.float32) * 0.1
    bias = jax.random.normal(k_b, (Cout,), dtype=jnp.float32) * 0.1

    conv = jax.jit(conv3x3_pallas)
    out = jax.block_until_ready(conv(x, weight, bias))

    # Reference: XLA conv (NCHW / OIHW, SAME padding) + bias.
    ref = lax.conv_general_dilated(
        x, weight, window_strides=(1, 1), padding=((1, 1), (1, 1)),
        dimension_numbers=("NCHW", "OIHW", "NCHW"),
        precision=lax.Precision.HIGHEST,
    ) + bias.reshape(1, Cout, 1, 1)

    assert out.shape == (N, Cout, H, W)
    max_err = float(jnp.max(jnp.abs(out - ref)))
    assert max_err < 2e-2, max_err
    print("KERNEL_OK")
</pallas_src>

<mosaic_0001>
module attributes {stable_mosaic.version = 11 : i64} {
  func.func @_conv3x3_kernel(%arg0: i32, %arg1: i32, %arg2: i32, %arg3: memref<1x4x384xf32, #tpu.memory_space<vmem>>, %arg4: memref<8x36xf32, #tpu.memory_space<vmem>>, %arg5: memref<8x1xf32, #tpu.memory_space<vmem>>, %arg6: memref<1x8x256xf32, #tpu.memory_space<vmem>>) attributes {dimension_semantics = [#tpu.dimension_semantics<parallel>, #tpu.dimension_semantics<parallel>, #tpu.dimension_semantics<arbitrary>], iteration_bounds = array<i64: 2, 1, 1>, scalar_prefetch = 0 : i64, scratch_operands = 0 : i64, tpu.core_type = #tpu.core_type<tc>, window_params = [{transform_indices = @transform_0, window_bounds = array<i64: 1, 4, 384>}, {transform_indices = @transform_1, window_bounds = array<i64: 8, 36>}, {transform_indices = @transform_2, window_bounds = array<i64: 8, 1>}, {transform_indices = @transform_3, window_bounds = array<i64: 1, 8, 256>}]} {
    %c0 = arith.constant 0 : index
    %c0_0 = arith.constant 0 : index
    %c0_1 = arith.constant 0 : index
    %0 = vector.load %arg3[%c0, %c0_0, %c0_1] : memref<1x4x384xf32, #tpu.memory_space<vmem>>, vector<1x4x384xf32>
    %1 = vector.shape_cast %0 : vector<1x4x384xf32> to vector<4x384xf32>
    %2 = tpu.iota {dimensions = array<i32: 1>} : vector<1x384xi32>
    %c16_i32 = arith.constant 16 : i32
    %c0_i32 = arith.constant 0 : i32
    %3 = arith.cmpi eq, %c16_i32, %c0_i32 : i32
    %c1_i32 = arith.constant 1 : i32
    %4 = arith.select %3, %c1_i32, %c16_i32 : i32
    %5 = vector.broadcast %4 : i32 to vector<1x384xi32>
    %6 = arith.remsi %2, %5 : vector<1x384xi32>
    %c0_i32_2 = arith.constant 0 : i32
    %7 = vector.broadcast %c0_i32_2 : i32 to vector<1x384xi32>
    %8 = arith.cmpi ne, %6, %7 : vector<1x384xi32>
    %c0_i32_3 = arith.constant 0 : i32
    %9 = vector.broadcast %c0_i32_3 : i32 to vector<1x384xi32>
    %10 = arith.cmpi slt, %6, %9 : vector<1x384xi32>
    %c0_i32_4 = arith.constant 0 : i32
    %11 = arith.cmpi slt, %4, %c0_i32_4 : i32
    %12 = vector.broadcast %11 : i1 to vector<1x384xi1>
    %13 = vector.broadcast %12 : vector<1x384xi1> to vector<1x384xi1>
    %14 = arith.xori %10, %13 : vector<1x384xi1>
    %15 = arith.andi %14, %8 : vector<1x384xi1>
    %16 = vector.broadcast %4 : i32 to vector<1x384xi32>
    %17 = arith.addi %6, %16 : vector<1x384xi32>
    %18 = arith.select %15, %17, %6 : vector<1x384xi1>, vector<1x384xi32>
    %c0_i32_5 = arith.constant 0 : i32
    %19 = vector.broadcast %c0_i32_5 : i32 to vector<1x384xi32>
    %20 = arith.cmpi eq, %18, %19 : vector<1x384xi32>
    %c1_i32_6 = arith.constant 1 : i32
    %21 = tpu.dynamic_rotate %1 by %c1_i32_6 dim 1 : vector<4x384xf32>, i32 -> vector<4x384xf32>
    %cst = arith.constant 0.000000e+00 : f32
    %22 = vector.shape_cast %20 : vector<1x384xi1> to vector<1x384xi1>
    %23 = vector.broadcast %22 : vector<1x384xi1> to vector<4x384xi1>
    %24 = vector.broadcast %cst : f32 to vector<4x384xf32>
    %25 = arith.select %23, %24, %21 : vector<4x384xi1>, vector<4x384xf32>
    %c15_i32 = arith.constant 15 : i32
    %26 = vector.broadcast %c15_i32 : i32 to vector<1x384xi32>
    %27 = arith.cmpi eq, %18, %26 : vector<1x384xi32>
    %c383_i32 = arith.constant 383 : i32
    %28 = tpu.dynamic_rotate %1 by %c383_i32 dim 1 : vector<4x384xf32>, i32 -> vector<4x384xf32>
    %cst_7 = arith.constant 0.000000e+00 : f32
    %29 = vector.shape_cast %27 : vector<1x384xi1> to vector<1x384xi1>
    %30 = vector.broadcast %29 : vector<1x384xi1> to vector<4x384xi1>
    %31 = vector.broadcast %cst_7 : f32 to vector<4x384xf32>
    %32 = arith.select %30, %31, %28 : vector<4x384xi1>, vector<4x384xf32>
    %33 = vector.extract_strided_slice %25 {offsets = [0, 0], sizes = [4, 256], strides = [1, 1]} : vector<4x384xf32> to vector<4x256xf32>
    %34 = vector.extract_strided_slice %1 {offsets = [0, 0], sizes = [4, 256], strides = [1, 1]} : vector<4x384xf32> to vector<4x256xf32>
    %35 = vector.extract_strided_slice %32 {offsets = [0, 0], sizes = [4, 256], strides = [1, 1]} : vector<4x384xf32> to vector<4x256xf32>
    %36 = vector.extract_strided_slice %25 {offsets = [0, 16], sizes = [4, 256], strides = [1, 1]} : vector<4x384xf32> to vector<4x256xf32>
    %37 = vector.extract_strided_slice %1 {offsets = [0, 16], sizes = [4, 256], strides = [1, 1]} : vector<4x384xf32> to vector<4x256xf32>
    %38 = vector.extract_strided_slice %32 {offsets = [0, 16], sizes = [4, 256], strides = [1, 1]} : vector<4x384xf32> to vector<4x256xf32>
    %39 = vector.extract_strided_slice %25 {offsets = [0, 32], sizes = [4, 256], strides = [1, 1]} : vector<4x384xf32> to vector<4x256xf32>
    %40 = vector.extract_strided_slice %1 {offsets = [0, 32], sizes = [4, 256], strides = [1, 1]} : vector<4x384xf32> to vector<4x256xf32>
    %41 = vector.extract_strided_slice %32 {offsets = [0, 32], sizes = [4, 256], strides = [1, 1]} : vector<4x384xf32> to vector<4x256xf32>
    %42 = tpu.concatenate %33, %34, %35, %36, %37, %38, %39, %40, %41 in 0 : vector<4x256xf32>, vector<4x256xf32>, vector<4x256xf32>, vector<4x256xf32>, vector<4x256xf32>, vector<4x256xf32>, vector<4x256xf32>, vector<4x256xf32>, vector<4x256xf32> -> vector<36x256xf32>
    %c0_8 = arith.constant 0 : index
    %c0_9 = arith.constant 0 : index
    %43 = vector.load %arg4[%c0_8, %c0_9] : memref<8x36xf32, #tpu.memory_space<vmem>>, vector<8x36xf32>
    %cst_10 = arith.constant dense<0.000000e+00> : vector<8x256xf32>
    %44 = tpu.matmul %43, %42, %cst_10 {dimension_numbers = #tpu.dot_dimension_numbers<[1], [0], [0], [1], [0, 0, 1, 1], [], []>} : vector<8x36xf32>, vector<36x256xf32>, vector<8x256xf32> -> vector<8x256xf32>
    %c0_11 = arith.constant 0 : index
    %c0_12 = arith.constant 0 : index
    %45 = vector.load %arg5[%c0_11, %c0_12] : memref<8x1xf32, #tpu.memory_space<vmem>>, vector<8x1xf32>
    %46 = vector.broadcast %45 : vector<8x1xf32> to vector<8x256xf32>
    %47 = arith.addf %44, %46 : vector<8x256xf32>
    %c0_13 = arith.constant 0 : index
    %c0_14 = arith.constant 0 : index
    %c0_15 = arith.constant 0 : index
    %48 = vector.load %arg6[%c0_13, %c0_14, %c0_15] : memref<1x8x256xf32, #tpu.memory_space<vmem>>, vector<1x8x256xf32>
    %49 = vector.shape_cast %48 : vector<1x8x256xf32> to vector<8x256xf32>
    %50 = vector.shape_cast %47 : vector<8x256xf32> to vector<1x8x256xf32>
    tpu.vector_store %arg6[%c0_13, %c0_14, %c0_15], %50 {strides = array<i32>} : memref<1x8x256xf32, #tpu.memory_space<vmem>>, vector<1x8x256xf32>,
    return
  }
  func.func @transform_0(%arg0: i32, %arg1: i32, %arg2: i32) -> (i32, i32, i32) {
    %c0_i32 = arith.constant 0 : i32
    %c0_i32_0 = arith.constant 0 : i32
    %c0_i32_1 = arith.constant 0 : i32
    return %arg0, %c0_i32, %c0_i32_0 : i32, i32, i32
  }
  func.func @transform_1(%arg0: i32, %arg1: i32, %arg2: i32) -> (i32, i32) {
    %c0_i32 = arith.constant 0 : i32
    %c0_i32_0 = arith.constant 0 : i32
    return %arg1, %c0_i32 : i32, i32
  }
  func.func @transform_2(%arg0: i32, %arg1: i32, %arg2: i32) -> (i32, i32) {
    %c0_i32 = arith.constant 0 : i32
    %c0_i32_0 = arith.constant 0 : i32
    return %arg1, %c0_i32 : i32, i32
  }
  func.func @transform_3(%arg0: i32, %arg1: i32, %arg2: i32) -> (i32, i32, i32) {
    %c0_i32 = arith.constant 0 : i32
    return %arg0, %arg1, %arg2 : i32, i32, i32
  }
}

</mosaic_0001>

<bundles_post_ra>
// kernel: conv3x3_pallas.1
= control target key start
LH: loop header
LB: loop body
LE: loop exit
PB: predicated region body
PF: predicated region fallthrough
CT: control target
= control target key end

     0   :  { %s776_s12 = smov 0   ;;  %s778_s13 = smov 0   ;;  %s878_s0 = inlined_call_operand.vmem [shape: f32[2,4,384], index: 0, kind: input, shape index: {}]   ;;  %s879_s1 = inlined_call_operand.vmem [shape: f32[8,36], index: 1, kind: input, shape index: {}]   ;;  %s880_s2 = inlined_call_operand.vmem [shape: f32[8,1], index: 2, kind: input, shape index: {}]   ;;  %s881_s3 = inlined_call_operand.vmem [shape: f32[2,8,256], index: 3, kind: output, shape index: {}]  }
   0x1   :  { %s780_s14 = smov 0  }
   0x2 LB: > { %s32_s15 = sadd.s32 1, %s745_s13  ;;  %p644_p0 = scmp.ge.s32.totalorder %s749_s14, 1  ;;  %s749_s14 = sphi %s780_s14, %s13_s14   ;;  %s745_s13 = sphi %s778_s13, %s883_s13   ;;  %s741_s12 = sphi %s776_s12, %s882_s12  }
   0x3   : > { %p34_p1 = scmp.ge.s32.totalorder %s32_s15, 2  ;;  %p178_p2 = scmp.lt.s32.totalorder %s749_s14, 3 }
   0x5   : > { %s885_s15 = smov (%p34_p1, %s32_s15), 0  ;;  %p179_p3 = pnand %p644_p0, %p178_p2 }
   0x6   : > { %p218_p4 = scmp.lt.s32.totalorder (!%p179_p3), %s741_s12, 1  ;;  %s751_s20 = smov (!%p179_p3), 1  }
   0x7   : > { %182 = sbr.rel (%p179_p3) target bundleno = 435 (0x1b3), region = 32  ;;  %s752_s21 = smov (!%p179_p3), 127  }
   0x8   : > { %s753_s22 = smov (!%p179_p3), 96   ;;  %s754_s23 = smov (!%p179_p3), 112  }
   0xc   : > { %s887_s12 = smov (!%p218_p4, %s741_s12), 1  ;;  %v247_v18 = vlaneseq  ;;  %v452_v59 = vld [vmem:[%s880_s2] sm:$0xff]  ;;  %v755_v60 = vmov 0   ;;  %vm412_vm8 = vcmask 785408   ;;  %vm442_vm9 = vcmask 1043456  }
   0xd   : > { %s655_s16 = smul.u32 12, %s887_s12  ;;  %725 = vset.pattern.permute.xlu1 %v755_v60  ;;  %726 = vset.pattern.permute.xlu0 %v755_v60  ;;  %vm369_vm10 = vcmask 916480   ;;  %vm458_vm11 = vcmask 293888   ;;  %s654_s28 = sshll.u32 %s887_s12, 4 }
   0xe   : > { %v248_v19 = vand.u32 127, %v247_v18  ;;  %s243_s4 = scalar_lea.vmem %s881_s3, %s654_s28 }
   0xf   : > { %s222_s19 = scalar_lea.vmem %s878_s0, %s655_s16 }
  0x10   : > { %v246_v0 = vld [vmem:[%s222_s19 + $0x8] sm:$0xf]  ;;  %v245_v1 = vld [vmem:[%s222_s19] sm:$0xff]  ;;  %v250_v20 = vadd.s32 256, %v248_v19  ;;  %vm338_vm0 = vcmp.lt.s32.totalorder %v248_v19, 127  ;;  %v249_v23 = vadd.s32 128, %v248_v19 }
  0x11   : > { %294 = vst [vmem:[#allocation1 + $0x10] ss:$2 sm:$0xff] %v246_v0  ;;  %v255_v28 = vand.u32 15, %v248_v19  ;;  %vm307_vm3 = vcmp.lt.s32.totalorder %v248_v19, 1 }
  0x12   : > { %292 = vst [vmem:[#allocation1] ss:$2 sm:$0xff] %v245_v1  ;;  %v269_v21 = vand.u32 15, %v250_v20  ;;  %v262_v27 = vand.u32 15, %v249_v23 }
  0x13   : > { %vm287_vm6 = vcmp.eq.s32.totalorder %v255_v28, 0  ;;  %vm320_vm7 = vcmp.eq.s32.totalorder %v255_v28, 15 }
  0x14   : > { %vm322_vm1 = vcmp.eq.s32.totalorder %v269_v21, 15  ;;  %vm321_vm2 = vcmp.eq.s32.totalorder %v262_v27, 15  ;;  %vm289_vm4 = vcmp.eq.s32.totalorder %v269_v21, 0  ;;  %vm288_vm5 = vcmp.eq.s32.totalorder %v262_v27, 0 }
  0x18   : > { %v297_v2 = vld.sshfl [vmem:[#allocation1 + $0x10] sm:$0xff pattern:$0x75316420] }
  0x19   : > { %325 = vst [vmem:[#allocation1 + $0x10] ss:$2 sm:$0xff] %v246_v0  ;;  %v295_v3 = vld.sshfl [vmem:[#allocation1] sm:$0xff pattern:$0x75316420]  ;;  %305 = vrot.lane.b32.xlu2 %v297_v2, %s751_s20 }
  0x1a   : > { %v296_v4 = vld.sshfl [vmem:[#allocation1 + $0x8] sm:$0xff pattern:$0x75316420] }
  0x1b   : > { %323 = vst [vmem:[#allocation1] ss:$2 sm:$0xff] %v245_v1  ;;  %v685_v8 = vpack.i.bf16 %v296_v4, %v295_v3 }
  0x20   : > { %v328_v5 = vld.sshfl [vmem:[#allocation1 + $0x10] sm:$0xff pattern:$0x75316420] }
  0x21   : > { %336 = vrot.lane.b32.xlu1 %v328_v5, %s752_s21  ;;  %376 = vst [vmem:[#allocation1 + $0x10] ss:$2 sm:$0xff] %v246_v0 }
  0x22   : > { %v326_v6 = vld.sshfl [vmem:[#allocation1] sm:$0xff pattern:$0x75316420]  ;;  %v327_v7 = vld.sshfl [vmem:[#allocation1 + $0x8] sm:$0xff pattern:$0x75316420] }
  0x23   : > { %332 = vrot.lane.b32.xlu0 %v326_v6, %s752_s21  ;;  %352 = vst [vmem:[#allocation1 + $0x1] ss:$2 sm:$0xff] %v245_v1 }
  0x28   : > { %v800_v9 = vld.sshfl [vmem:[#allocation1 + $0x10] sm:$0xff pattern:$0x75316420] }
  0x29   : > { %420 = vst [vmem:[#allocation1 + $0x11] ss:$2 sm:$0xff] %v246_v0  ;;  %686 = vrot.lane.b32.xlu1 %v685_v8, %s751_s20 }
  0x2a   : > { %v802_v10 = vld.sshfl [vmem:[#allocation1] sm:$0xff pattern:$0x75316420]  ;;  %v804_v11 = vld.sshfl [vmem:[#allocation1 + $0x8] sm:$0xff pattern:$0x75316420] }
  0x2b   : > { %334 = vrot.lane.b32.xlu0 %v327_v7, %s752_s21  ;;  %374 = vst [vmem:[#allocation1] ss:$2 sm:$0xff] %v245_v1 }
  0x30   : > { %v423_v14 = vld.sshfl [vmem:[#allocation1 + $0x10] sm:$0xff pattern:$0x75316420] }
  0x32   : > { %v377_v12 = vld.sshfl [vmem:[#allocation1] sm:$0xff pattern:$0x75316420]  ;;  %v378_v13 = vld.sshfl [vmem:[#allocation1 + $0x8] sm:$0xff pattern:$0x75316420] }
  0x33   : > { %418 = vst [vmem:[#allocation1 + $0x1] ss:$2 sm:$0xff] %v245_v1  ;;  %v690_v17 = vpack.i.bf16 %v378_v13, %v377_v12 }
  0x35   : > { %691 = vrot.lane.b32.xlu2 %v690_v17, %s754_s23 }
  0x3a   : > { %v422_v15 = vld.sshfl [vmem:[#allocation1 + $0x8] sm:$0xff pattern:$0x75316420]  ;;  %v421_v34 = vld.sshfl [vmem:[#allocation1] sm:$0xff pattern:$0x75316420] }
  0x3b   : > { %v695_v16 = vpack.i.bf16 %v423_v14, %v422_v15 }
  0x3d   : > { %696 = vrot.lane.b32.xlu1 %v695_v16, %s753_s22 }
  0x73   : > { %v306_v30 = vpop.permute.xlu2 %305 }
  0x8f   : > { %v692_v56 = vpop.permute.xlu2 %691 }
  0x90   : > { %v694_v19 = vunpack.i.h.bf16 %v692_v56  ;;  %v693_v20 = vunpack.i.l.bf16 %v692_v56 }
  0x92   : > { %v386_v28 = vsel %vm369_vm10, %v693_v20, %v694_v19 }
  0x93   : > { %v337_v22 = vpop.permute.xlu1 %336 }
  0x95   : > { %v333_v24 = vpop.permute.xlu0 %332 }
  0x96   : > { %v341_v25 = vsel %vm338_vm0, %v337_v22, %v333_v24 }
  0x97   : > { %v350_v26 = vsel %vm322_vm1, 0.0, %v341_v25 }
  0x98   : > { %438 = vrot.lane.b32.xlu1 %v350_v26, %s753_s22  ;;  %v395_v42 = vrot.slane %v350_v26, 4 }
  0x9b   : > { %v687_v29 = vpop.permute.xlu1 %686 }
  0x9c   : > { %v689_v31 = vunpack.i.h.bf16 %v687_v29  ;;  %v688_v32 = vunpack.i.l.bf16 %v687_v29 }
  0x9d   : > { %v335_v33 = vpop.permute.xlu0 %334 }
  0x9e   : > { %v339_v35 = vsel %vm338_vm0, %v335_v33, %v337_v22  ;;  %v308_v36 = vsel %vm307_vm3, %v689_v31, %v306_v30  ;;  %v309_v37 = vsel %vm307_vm3, %v688_v32, %v689_v31  ;;  %v310_v39 = vsel %vm307_vm3, %v306_v30, %v688_v32 }
  0x9f   : > { %v811_v38 = vsel %vm321_vm2, 0.0, %v339_v35  ;;  %v319_v40 = vsel %vm289_vm4, 0.0, %v308_v36  ;;  %v813_v41 = vsel %vm288_vm5, 0.0, %v309_v37  ;;  %v816_v44 = vsel %vm287_vm6, 0.0, %v310_v39  ;;  %v451_v36 = vld [vmem:[%s879_s1] sm:$0xff] }
  0xa0   : > { %v394_v43 = vrot.slane %v811_v38, 4  ;;  %v705_v45 = vpack.i.bf16 %v421_v34, %v319_v40  ;;  %v700_v46 = vpack.i.bf16 %v813_v41, %v816_v44  ;;  %v340_v48 = vsel %vm338_vm0, %v333_v24, %v335_v33 }
  0xa1   : > { %v824_v49 = vsel %vm320_vm7, 0.0, %v340_v48  ;;  %v360_v51 = vrot.slane %v816_v44, 4  ;;  %v361_v52 = vrot.slane %v813_v41, 4  ;;  %v362_v55 = vrot.slane %v319_v40, 4 }
  0xa2   : > { %v715_v47 = vpack.i.bf16 %v395_v42, %v394_v43  ;;  %706 = vrot.lane.b32.xlu0 %v705_v45, %s753_s22  ;;  %701 = vrot.lane.b32.xlu2 %v700_v46, %s753_s22  ;;  %v393_v50 = vrot.slane %v824_v49, 4  ;;  %v443_v39 = vsel %vm442_vm9, %v816_v44, %v802_v10  ;;  %v444_v43 = vsel %vm442_vm9, %v813_v41, %v804_v11 }
  0xa3   : > { %v720_v54 = vpack.i.bf16 %v361_v52, %v360_v51 }
  0xa4   : > { %716 = vrot.lane.b32.xlu1 %v715_v47, %s754_s23  ;;  %v710_v53 = vpack.i.bf16 %v393_v50, %v800_v9 }
  0xaa   : > { %436 = vrot.lane.b32.xlu0 %v811_v38, %s753_s22  ;;  %434 = vrot.lane.b32.xlu2 %v824_v49, %s753_s22 }
  0xac   : > { %455 = vperm.xlu1 %725, %v452_v59  }
  0xaf   : > { %v697_v58 = vpop.permute.xlu1 %696 }
  0xb0   : > { %v699_v63 = vunpack.i.h.bf16 %v697_v58  ;;  %v698_v0 = vunpack.i.l.bf16 %v697_v58 }
  0xb2   : > { %711 = vrot.lane.b32.xlu0 %v710_v53, %s754_s23  ;;  %721 = vrot.lane.b32.xlu2 %v720_v54, %s754_s23  ;;  %v431_v9 = vsel %vm412_vm8, %v698_v0, %v699_v63 }
  0xba   : > { %367 = vrot.lane.b32.xlu0 %v362_v55, %s754_s23 }
  0xfc   : > { %v702_v57 = vpop.permute.xlu2 %701 }
  0xfd   : > { %v704_v4 = vunpack.i.h.bf16 %v702_v57  ;;  %v703_v5 = vunpack.i.l.bf16 %v702_v57 }
  0xff   : > { %v413_v14 = vsel %vm412_vm8, %v703_v5, %v704_v4 }
 0x104   : > { %v435_v62 = vpop.permute.xlu2 %434 }
 0x10a   : > { %v439_v1 = vpop.permute.xlu1 %438 }
 0x10c   : > { %v722_v17 = vpop.permute.xlu2 %721 }
 0x10d   : > { %v724_v21 = vunpack.i.h.bf16 %v722_v17  ;;  %v723_v22 = vunpack.i.l.bf16 %v722_v17 }
 0x10f   : > { %v370_v32 = vsel %vm369_vm10, %v723_v22, %v724_v21 }
 0x110   : > { %v445_v35 = vsel %vm442_vm9, %v824_v49, %v370_v32 }
 0x114   : > { %v707_v61 = vpop.permute.xlu0 %706 }
 0x115   : > { %v709_v2 = vunpack.i.h.bf16 %v707_v61  ;;  %v708_v3 = vunpack.i.l.bf16 %v707_v61 }
 0x116   : > { %v717_v18 = vpop.permute.xlu1 %716 }
 0x117   : > { %v430_v7 = vsel %vm412_vm8, %v709_v2, %v698_v0  ;;  %v414_v8 = vsel %vm412_vm8, %v704_v4, %v708_v3  ;;  %v719_v23 = vunpack.i.h.bf16 %v717_v18  ;;  %v718_v24 = vunpack.i.l.bf16 %v717_v18 }
 0x118   : > { %v449_v15 = vsel %vm442_vm9, %v413_v14, %v430_v7  ;;  %v450_v16 = vsel %vm442_vm9, %v414_v8, %v431_v9 }
 0x119   : > { %v403_v31 = vsel %vm369_vm10, %v718_v24, %v719_v23 }
 0x11c   : > { %v437_v6 = vpop.permute.xlu0 %436 }
 0x11d   : > { %v440_v12 = vsel %vm412_vm8, %v435_v62, %v437_v6  ;;  %v441_v13 = vsel %vm412_vm8, %v437_v6, %v439_v1 }
 0x11e   : > { %648 = vmatpush.msk.msra.mxu0 %vm442_vm9, %v440_v12  ;;  %650 = vmatpush.msk.msra.mxu1 %vm442_vm9, %v441_v13  ;;  %v456_v45 = vpop.permute.xlu1 %455 }
 0x120   : > { %478 = vmatpush.msra.mxu0 %v449_v15  ;;  %498 = vmatpush.msra.mxu1 %v450_v16 }
 0x124   : > { %v712_v25 = vpop.permute.xlu0 %711 }
 0x125   : > { %v714_v26 = vunpack.i.h.bf16 %v712_v25  ;;  %v713_v27 = vunpack.i.l.bf16 %v712_v25 }
 0x127   : > { %v402_v29 = vsel %vm369_vm10, %v714_v26, %v718_v24  ;;  %v387_v30 = vsel %vm369_vm10, %v694_v19, %v713_v27 }
 0x128   : > { %v447_v33 = vsel %vm442_vm9, %v386_v28, %v402_v29  ;;  %v448_v34 = vsel %vm442_vm9, %v387_v30, %v403_v31 }
 0x129   : > { %479 = vmatpush.msra.mxu0 %v447_v33  ;;  %499 = vmatpush.msra.mxu1 %v448_v34 }
 0x12b   : > { %480 = vmatpush.msra.mxu0 %v445_v35 }
 0x12c   : > { %v368_v37 = vpop.permute.xlu0 %367 }
 0x12d   : > { %v371_v40 = vsel %vm369_vm10, %v724_v21, %v368_v37  ;;  %481 = vmatpush.msra.mxu0 %v443_v39 }
 0x12e   : > { %v446_v42 = vsel %vm442_vm9, %v811_v38, %v371_v40  ;;  %649 = vmatmul.msk.f32.vlgmr.msra.gmra.mxu0 %vm458_vm11, %v451_v36 }
 0x12f   : > { %500 = vmatpush.msra.mxu1 %v446_v42 }
 0x131   : > { %501 = vmatpush.msra.mxu1 %v444_v43 }
 0x132   : > { %651 = vmatmul.msk.f32.vlgmr.msra.gmra.mxu1 %vm458_vm11, %v451_v36 }
 0x1ab   : > { %v483_v10 = vpop.f32.mrf.mxu0 }
 0x1ac   : > { %v484_v44 = vadd.f32 %v483_v10, %v456_v45 }
 0x1ae   : > { %506 = vst [vmem:[%s243_s4] sm:$0xff] %v484_v44 }
 0x1af   : > { %v503_v46 = vpop.f32.mrf.mxu1 }
 0x1b0   : > { %v504_v47 = vadd.f32 %v503_v46, %v456_v45 }
 0x1b2   : > { %507 = vst [vmem:[%s243_s4 + $0x8] sm:$0xff] %v504_v47 }
 0x1b3 PF: > { %s13_s14 = sadd.s32 1, %s749_s14   ;;  %s882_s12 = smov %s745_s13 }
 0x1b4   : > { %p10_p5 = scmp.ge.s32.totalorder %s13_s14, 4   ;;  %s883_s13 = smov %s885_s15 }
 0x1b6   :  { %12 = sbr.rel (!%p10_p5) target bundleno = 2 (0x2), region = 74 }

</bundles_post_ra>
